<compile_context>
chip_gen: v7x
topology: tpu7x:2x2x1
jax: 0.10.0
libtpu: 0.0.40
codegen_flags: <defaults>
</compile_context>

<pallas_src>
import jax
import jax.numpy as jnp
from jax.experimental import pallas as pl
from jax.experimental.pallas import tpu as pltpu

MAX_LENGTH = 15
LANES = 128
NEG_BIG = -1e30                  # mask value for padded softmax / log-softmax columns
V_TILE_MAX = 512                 # vocab tile width for the projection phase
_VMEM_LIMIT = 48 * 1024 * 1024   # > scoped defaults (16/32 MiB), < v7x physical 64 MiB


def _round_up(x, m):
    return (x + m - 1) // m * m


def _v_tiling(v):
    """Vocab tile width tv (multiple of 128) and padded vocab Vp (multiple of tv)."""
    tv = min(V_TILE_MAX, _round_up(v, LANES))
    return tv, _round_up(v, tv)


# ----------------------------------------------------------------------------
# Phase A: token-side matmul for ALL steps at once (no dependence on the hidden)
#   m1_all = emb_all(Tc,H) @ [W_attn_top | W_comb_top](H, Lp+H)
# ----------------------------------------------------------------------------
def _m1_kernel(emb_ref, w_emb_ref, m1_ref):
    m1_ref[...] = jnp.dot(emb_ref[...], w_emb_ref[...],
                          preferred_element_type=jnp.float32)


# ----------------------------------------------------------------------------
# Phase B: sequential recurrence (attention -> combine -> LSTM), hidden carried
# in a VMEM scratch.  grid=(n_chunks,), chunk_steps decode steps per grid point.
# No w_out here: the vocab projection is deferred to phase C.
# ----------------------------------------------------------------------------
def _recurrence_kernel(m1_ref,        # (C, Lp+H) f32  precomputed token-side matmul rows
                       hid0_ref,      # (1, H)  f32  initial hidden
                       enc_ref,       # (Lp, H) bf16 encoder outputs (zero-padded rows)
                       w_h0_ref,      # (H, Lp+3H) bf16 [W_attn_bot | W_hh(i,g,o)]
                       b_attn_ref,    # (1, Lp) f32 (padded cols = NEG_BIG)
                       w_cb_ref,      # (H, H)  bf16 W_comb_bot
                       b_comb_ref,    # (1, H)  f32
                       w_ih_ref,      # (H, 3H) bf16 W_ih(i,g,o)
                       b_gates_ref,   # (1, 3H) f32  (b_ih + b_hh)(i,g,o)
                       hid_out_ref,   # (C, 1, H)  f32 out
                       attn_ref,      # (C, 1, Lp) f32 out
                       h_scr):        # (1, H) f32 hidden carried across grid steps
    H = hid0_ref.shape[1]
    Lp = b_attn_ref.shape[1]
    C = m1_ref.shape[0]

    @pl.when(pl.program_id(0) == 0)
    def _():
        h_scr[...] = hid0_ref[...]

    # Statically unrolled inner loop over the C decode steps of this chunk
    # (amortizes the per-grid-step pipeline prologue/epilogue).
    for c in range(C):
        m1 = m1_ref[pl.ds(c, 1), :]                     # (1, Lp+H) f32
        h0_bf = h_scr[...].astype(jnp.bfloat16)         # (1, H)

        # Fused shared-LHS matmul: h0 @ [W_attn_bot | W_hh(i,g,o)]
        m2 = jnp.dot(h0_bf, w_h0_ref[...],
                     preferred_element_type=jnp.float32)        # (1, Lp+3H)

        # --- attention weights: softmax over Lp lanes (padded cols masked to NEG_BIG)
        attn_logits = m1[:, :Lp] + m2[:, :Lp] + b_attn_ref[...]
        a_max = jnp.max(attn_logits, axis=1, keepdims=True)
        a_exp = jnp.exp(attn_logits - a_max)
        a_sum = jnp.sum(a_exp, axis=1, keepdims=True)
        attn = a_exp * pl.reciprocal(a_sum, approx=True)        # EUP recip, VALU stays free
        attn_ref[c] = attn

        # --- apply attention (padded attn cols ~0, padded enc rows are 0)
        applied = jnp.dot(attn.astype(jnp.bfloat16), enc_ref[...],
                          preferred_element_type=jnp.float32)   # (1, H)

        # --- attention combine + ReLU -> LSTM input
        comb = (m1[:, Lp:]
                + jnp.dot(applied.astype(jnp.bfloat16), w_cb_ref[...],
                          preferred_element_type=jnp.float32)
                + b_comb_ref[...])
        x = jnp.maximum(comb, 0.0)                              # (1, H)

        # --- LSTM step; c0 == 0 every call (module semantics) so the forget gate is dead
        gates = (jnp.dot(x.astype(jnp.bfloat16), w_ih_ref[...],
                         preferred_element_type=jnp.float32)
                 + m2[:, Lp:] + b_gates_ref[...])               # (1, 3H): i, g, o
        i_g = jax.nn.sigmoid(gates[:, 0:H])
        g_g = jnp.tanh(gates[:, H:2 * H])
        o_g = jax.nn.sigmoid(gates[:, 2 * H:3 * H])
        h1 = o_g * jnp.tanh(i_g * g_g)                          # (1, H) f32

        h_scr[...] = h1
        hid_out_ref[c] = h1


# ----------------------------------------------------------------------------
# Phase C: vocab projection GEMM (M=T), tiled over V, parallel across V tiles.
# Also emits per-tile max / sum-exp for the two-pass log-softmax.
# ----------------------------------------------------------------------------
def _project_kernel(h1_ref,       # (T, H)  bf16 all hidden states
                    w_out_ref,    # (H, tv) bf16 vocab tile (zero-padded cols)
                    b_out_ref,    # (1, tv) f32  (padded cols = NEG_BIG)
                    logits_ref,   # (T, tv) f32 out
                    tmax_ref,     # (1, T, 1) f32 out  per-tile row max
                    tsum_ref):    # (1, T, 1) f32 out  per-tile sum(exp(x - max))
    logits = jnp.dot(h1_ref[...], w_out_ref[...],
                     preferred_element_type=jnp.float32) + b_out_ref[...]
    logits_ref[...] = logits
    m = jnp.max(logits, axis=1, keepdims=True)                  # (T, 1)
    tmax_ref[0] = m
    tsum_ref[0] = jnp.sum(jnp.exp(logits - m), axis=1, keepdims=True)


# ----------------------------------------------------------------------------
# Phase D: second pass of the log-softmax: combine per-tile stats into the
# global log-sum-exp and normalize each V tile.  Parallel across V tiles.
# ----------------------------------------------------------------------------
def _logsoftmax_kernel(logits_ref,   # (T, tv)   f32
                       tmax_ref,     # (nv, T, 1) f32 (all tiles)
                       tsum_ref,     # (nv, T, 1) f32 (all tiles)
                       logp_ref):    # (T, tv)   f32 out
    m_all = tmax_ref[...]
    s_all = tsum_ref[...]
    m_g = jnp.max(m_all, axis=0)                                        # (T, 1)
    lse = m_g + jnp.log(jnp.sum(jnp.exp(m_all - m_g) * s_all, axis=0))  # (T, 1)
    logp_ref[...] = logits_ref[...] - lse


def attn_decoder_decode(tokens, hidden0, encoder_outputs, packed, *,
                        output_size, max_length, chunk_steps=8):
    """Run T teacher-forced decode steps.

    tokens: (T,) int; hidden0: (1,1,H) f32; encoder_outputs: (L,H).
    Returns (log_softmax (T,V), hidden after each step (T,H), attn_weights (T,L)).
    """
    H = hidden0.shape[-1]
    V = output_size
    L = max_length
    Lp = packed["b_attn_pad"].shape[1]
    tv, Vp = _v_tiling(V)
    assert packed["b_out_pad"].shape[1] == Vp
    nv = Vp // tv
    T = int(tokens.shape[0])

    C = max(1, min(chunk_steps, T))         # decode steps per grid point
    Tc = _round_up(T, C)
    n_chunks = Tc // C

    tokens = jnp.clip(tokens.astype(jnp.int32), 0, V - 1)   # keep gather index in range
    tok_pad = jnp.zeros((Tc,), jnp.int32).at[:T].set(tokens)
    emb_all = jnp.take(packed["embedding"], tok_pad, axis=0)       # (Tc, H) bf16
    hid2d = hidden0.reshape(1, H).astype(jnp.float32)
    enc_pad = jnp.zeros((Lp, H), jnp.bfloat16).at[:L, :].set(
        encoder_outputs.astype(jnp.bfloat16))

    # --- Phase A: m1_all = emb_all @ [W_attn_top | W_comb_top]  (one M=Tc GEMM)
    m1_all = pl.pallas_call(
        _m1_kernel,
        out_shape=jax.ShapeDtypeStruct((Tc, Lp + H), jnp.float32),
        compiler_params=pltpu.CompilerParams(vmem_limit_bytes=_VMEM_LIMIT),
    )(emb_all, packed["w_emb_fused"])

    # --- Phase B: sequential recurrence (hidden carried in scratch -> MUST stay
    # "arbitrary"; a parallel/core_parallel step axis would corrupt the carry).
    _const2 = lambda tc: (0, 0)
    rec_spec = pltpu.PrefetchScalarGridSpec(
        num_scalar_prefetch=0,
        grid=(n_chunks,),
        in_specs=[
            pl.BlockSpec((C, Lp + H), lambda tc: (tc, 0)),     # m1 rows of this chunk
            pl.BlockSpec((1, H), _const2),                     # initial hidden
            pl.BlockSpec((Lp, H), _const2),                    # encoder outputs (padded)
            pl.BlockSpec((H, Lp + 3 * H), _const2),            # w_h0_fused
            pl.BlockSpec((1, Lp), _const2),                    # b_attn_pad
            pl.BlockSpec((H, H), _const2),                     # w_comb_bot
            pl.BlockSpec((1, H), _const2),                     # b_comb
            pl.BlockSpec((H, 3 * H), _const2),                 # w_ih_igo
            pl.BlockSpec((1, 3 * H), _const2),                 # b_gates
        ],
        out_specs=(
            pl.BlockSpec((C, 1, H), lambda tc: (tc, 0, 0)),
            pl.BlockSpec((C, 1, Lp), lambda tc: (tc, 0, 0)),
        ),
        scratch_shapes=[pltpu.VMEM((1, H), jnp.float32)],
    )
    hid_p, attn_p = pl.pallas_call(
        _recurrence_kernel,
        out_shape=(jax.ShapeDtypeStruct((Tc, 1, H), jnp.float32),
                   jax.ShapeDtypeStruct((Tc, 1, Lp), jnp.float32)),
        grid_spec=rec_spec,
        compiler_params=pltpu.CompilerParams(
            dimension_semantics=("arbitrary",),
            vmem_limit_bytes=_VMEM_LIMIT),
    )(m1_all, hid2d, enc_pad,
      packed["w_h0_fused"], packed["b_attn_pad"],
      packed["w_comb_bot"], packed["b_comb"],
      packed["w_ih_igo"], packed["b_gates"])

    hid = hid_p[:T, 0, :]                     # (T, H) f32
    h1_bf = hid.astype(jnp.bfloat16)          # (T, H) bf16 LHS for the projection GEMM

    # --- Phase C: projection GEMM, M=T, tiled over V (parallel -> dual-TC on v7x)
    proj_spec = pltpu.PrefetchScalarGridSpec(
        num_scalar_prefetch=0,
        grid=(nv,),
        in_specs=[
            pl.BlockSpec((T, H), lambda v: (0, 0)),
            pl.BlockSpec((H, tv), lambda v: (0, v)),
            pl.BlockSpec((1, tv), lambda v: (0, v)),
        ],
        out_specs=(
            pl.BlockSpec((T, tv), lambda v: (0, v)),
            pl.BlockSpec((1, T, 1), lambda v: (v, 0, 0)),
            pl.BlockSpec((1, T, 1), lambda v: (v, 0, 0)),
        ),
    )
    logits_p, tmax, tsum = pl.pallas_call(
        _project_kernel,
        out_shape=(jax.ShapeDtypeStruct((T, Vp), jnp.float32),
                   jax.ShapeDtypeStruct((nv, T, 1), jnp.float32),
                   jax.ShapeDtypeStruct((nv, T, 1), jnp.float32)),
        grid_spec=proj_spec,
        compiler_params=pltpu.CompilerParams(
            dimension_semantics=("parallel",),
            vmem_limit_bytes=_VMEM_LIMIT),
    )(h1_bf, packed["w_out_pad"], packed["b_out_pad"])

    # --- Phase D: normalize (second pass of the two-pass log-softmax)
    norm_spec = pltpu.PrefetchScalarGridSpec(
        num_scalar_prefetch=0,
        grid=(nv,),
        in_specs=[
            pl.BlockSpec((T, tv), lambda v: (0, v)),
            pl.BlockSpec((nv, T, 1), lambda v: (0, 0, 0)),
            pl.BlockSpec((nv, T, 1), lambda v: (0, 0, 0)),
        ],
        out_specs=pl.BlockSpec((T, tv), lambda v: (0, v)),
    )
    logp_p = pl.pallas_call(
        _logsoftmax_kernel,
        out_shape=jax.ShapeDtypeStruct((T, Vp), jnp.float32),   # keep f32; bf16 possible
        grid_spec=norm_spec,
        compiler_params=pltpu.CompilerParams(
            dimension_semantics=("parallel",),
            vmem_limit_bytes=_VMEM_LIMIT),
    )(logits_p, tmax, tsum)

    return logp_p[:, :V], hid, attn_p[:T, 0, :L]


def attn_decoder_forward(token, hidden, encoder_outputs, packed, *, output_size, max_length):
    """Single forward step matching the PyTorch module signature (batched=False)."""
    logp, hids, attn = attn_decoder_decode(
        token.reshape(1), hidden, encoder_outputs, packed,
        output_size=output_size, max_length=max_length)
    return logp, hids[-1].reshape(1, 1, -1), attn


def init_raw_params(key, hidden_size, output_size, max_length):
    """PyTorch-layout (already transposed) master weights in f32."""
    H, V, L = hidden_size, output_size, max_length
    ks = jax.random.split(key, 11)
    s_h = 1.0 / jnp.sqrt(H)
    s_2h = 1.0 / jnp.sqrt(2 * H)

    def u(k, shape, scale):
        return jax.random.uniform(k, shape, jnp.float32, -scale, scale)

    return {
        "embedding": jax.random.normal(ks[0], (V, H), jnp.float32),
        "w_attn_t": u(ks[1], (2 * H, L), s_2h),   # attentionNB: Linear(2H -> L), transposed
        "b_attn":   u(ks[2], (1, L), s_2h),
        "w_comb_t": u(ks[3], (2 * H, H), s_2h),   # attention_combine: Linear(2H -> H), transposed
        "b_comb":   u(ks[4], (1, H), s_2h),
        "w_ih_t": u(ks[5], (H, 4 * H), s_h),      # LSTM weight_ih^T (gate order i,f,g,o)
        "b_ih":   u(ks[6], (1, 4 * H), s_h),
        "w_hh_t": u(ks[7], (H, 4 * H), s_h),      # LSTM weight_hh^T
        "b_hh":   u(ks[8], (1, 4 * H), s_h),
        "w_out_t": u(ks[9], (H, V), s_h),         # out: Linear(H -> V), transposed
        "b_out":   u(ks[10], (1, V), s_h),
    }


def pack_params(raw, hidden_size, output_size, max_length):
    """Pad / fuse / cast the raw weights into the kernel layout (bf16 weights, f32 biases)."""
    H, V, L = hidden_size, output_size, max_length
    Lp = _round_up(L, LANES)
    _, Vp = _v_tiling(V)
    bf16 = jnp.bfloat16

    # Forget gate is dead (c0 == 0 every call): keep only i, g, o columns.
    idx_igo = jnp.concatenate([jnp.arange(0, H),
                               jnp.arange(2 * H, 3 * H),
                               jnp.arange(3 * H, 4 * H)])
    w_ih_igo = raw["w_ih_t"][:, idx_igo]
    w_hh_igo = raw["w_hh_t"][:, idx_igo]
    b_gates = (raw["b_ih"] + raw["b_hh"])[:, idx_igo]

    # attentionNB weight zero-padded to lane-dense Lp columns; bias padded with NEG_BIG.
    w_attn_pad = jnp.zeros((2 * H, Lp), jnp.float32).at[:, :L].set(raw["w_attn_t"])
    b_attn_pad = jnp.full((1, Lp), NEG_BIG, jnp.float32).at[:, :L].set(raw["b_attn"])

    return {
        "embedding": raw["embedding"].astype(bf16),                          # (V, H)
        "w_emb_fused": jnp.concatenate([w_attn_pad[:H], raw["w_comb_t"][:H]],
                                       axis=1).astype(bf16),                 # (H, Lp+H)
        "w_h0_fused": jnp.concatenate([w_attn_pad[H:], w_hh_igo],
                                      axis=1).astype(bf16),                  # (H, Lp+3H)
        "b_attn_pad": b_attn_pad,
        "w_comb_bot": raw["w_comb_t"][H:].astype(bf16),
        "b_comb": raw["b_comb"].astype(jnp.float32),
        "w_ih_igo": w_ih_igo.astype(bf16),
        "b_gates": b_gates.astype(jnp.float32),
        "w_out_pad": jnp.zeros((H, Vp), jnp.float32).at[:, :V].set(raw["w_out_t"]).astype(bf16),
        "b_out_pad": jnp.full((1, Vp), NEG_BIG, jnp.float32).at[:, :V].set(raw["b_out"]),
    }


def reference_step(raw, tok, h0_2d, enc):
    """Literal (unfused) module math in plain JAX, with the same bf16 weight casts."""
    bf = lambda a: a.astype(jnp.bfloat16)
    H = h0_2d.shape[1]
    emb = raw["embedding"][tok].reshape(1, H)
    cat1 = jnp.concatenate([emb, h0_2d], axis=1)
    attn_logits = jnp.dot(bf(cat1), bf(raw["w_attn_t"]),
                          preferred_element_type=jnp.float32) + raw["b_attn"]
    attn = jax.nn.softmax(attn_logits, axis=1)
    applied = jnp.dot(bf(attn), bf(enc), preferred_element_type=jnp.float32)
    cat2 = jnp.concatenate([emb, applied], axis=1)
    comb = jnp.dot(bf(cat2), bf(raw["w_comb_t"]),
                   preferred_element_type=jnp.float32) + raw["b_comb"]
    x = jnp.maximum(comb, 0.0)
    gates = (jnp.dot(bf(x), bf(raw["w_ih_t"]), preferred_element_type=jnp.float32) + raw["b_ih"]
             + jnp.dot(bf(h0_2d), bf(raw["w_hh_t"]), preferred_element_type=jnp.float32)
             + raw["b_hh"])
    i_g = jax.nn.sigmoid(gates[:, 0:H])
    g_g = jnp.tanh(gates[:, 2 * H:3 * H])
    o_g = jax.nn.sigmoid(gates[:, 3 * H:4 * H])
    h1 = o_g * jnp.tanh(i_g * g_g)          # c0 == 0 -> forget gate contributes nothing
    logits = jnp.dot(bf(h1), bf(raw["w_out_t"]),
                     preferred_element_type=jnp.float32) + raw["b_out"]
    return jax.nn.log_softmax(logits, axis=1), h1, attn


if __name__ == "__main__":
    H = 32            # hidden_size
    V = 40            # output_size (vocab)
    L = MAX_LENGTH    # 15
    T = 6             # fused decode steps

    key = jax.random.PRNGKey(0)
    kp, kh, ke, kt = jax.random.split(key, 4)

    raw = init_raw_params(kp, H, V, L)
    packed = pack_params(raw, H, V, L)

    hidden0 = jax.random.normal(kh, (1, 1, H), jnp.float32)
    encoder_outputs = jax.random.normal(ke, (L, H), jnp.float32)
    tokens = jax.random.randint(kt, (T,), 0, V, dtype=jnp.int32)

    # Multi-step decode: sequential recurrence kernel + deferred M=T vocab projection.
    logp, hiddens, attn_w = attn_decoder_decode(
        tokens, hidden0, encoder_outputs, packed, output_size=V, max_length=L)
    jax.block_until_ready((logp, hiddens, attn_w))
    assert logp.shape == (T, V) and hiddens.shape == (T, H) and attn_w.shape == (T, L)

    # Single-step call matching the module signature (batched=False).
    logp1, hid1, attn1 = attn_decoder_forward(
        tokens[:1], hidden0, encoder_outputs, packed, output_size=V, max_length=L)
    jax.block_until_ready((logp1, hid1, attn1))
    assert logp1.shape == (1, V) and hid1.shape == (1, 1, H) and attn1.shape == (1, L)

    # Pure-JAX reference of the literal module math (hidden carried, cell reset to 0 each step).
    h = hidden0.reshape(1, H)
    ref_lp, ref_h, ref_a = [], [], []
    for t in range(T):
        lp, h, aw = reference_step(raw, int(tokens[t]), h, encoder_outputs)
        ref_lp.append(lp); ref_h.append(h); ref_a.append(aw)
    ref_lp = jnp.concatenate(ref_lp, 0)
    ref_h = jnp.concatenate(ref_h, 0)
    ref_a = jnp.concatenate(ref_a, 0)

    err = max(float(jnp.max(jnp.abs(logp - ref_lp))),
              float(jnp.max(jnp.abs(hiddens - ref_h))),
              float(jnp.max(jnp.abs(attn_w - ref_a))))
    assert err < 5e-2, f"kernel/reference mismatch: max abs err = {err}"
    print("KERNEL_OK")
</pallas_src>

<mosaic_0001>
module attributes {stable_mosaic.version = 11 : i64} {
  func.func @_m1_kernel(%arg0: memref<6x32xbf16, #tpu.memory_space<vmem>>, %arg1: memref<32x160xbf16, #tpu.memory_space<vmem>>, %arg2: memref<6x160xf32, #tpu.memory_space<vmem>>) attributes {dimension_semantics = [], scalar_prefetch = 0 : i64, scratch_operands = 0 : i64, tpu.core_type = #tpu.core_type<tc>} {
    %c0 = arith.constant 0 : index
    %c0_0 = arith.constant 0 : index
    %0 = vector.load %arg0[%c0, %c0_0] : memref<6x32xbf16, #tpu.memory_space<vmem>>, vector<6x32xbf16>
    %c0_1 = arith.constant 0 : index
    %c0_2 = arith.constant 0 : index
    %1 = vector.load %arg1[%c0_1, %c0_2] : memref<32x160xbf16, #tpu.memory_space<vmem>>, vector<32x160xbf16>
    %cst = arith.constant dense<0.000000e+00> : vector<6x160xf32>
    %2 = tpu.matmul %0, %1, %cst {dimension_numbers = #tpu.dot_dimension_numbers<[1], [0], [0], [1], [0, 0, 1, 1], [], []>} : vector<6x32xbf16>, vector<32x160xbf16>, vector<6x160xf32> -> vector<6x160xf32>
    %c0_3 = arith.constant 0 : index
    %c0_4 = arith.constant 0 : index
    %3 = vector.load %arg2[%c0_3, %c0_4] : memref<6x160xf32, #tpu.memory_space<vmem>>, vector<6x160xf32>
    tpu.vector_store %arg2[%c0_3, %c0_4], %2 {strides = array<i32>} : memref<6x160xf32, #tpu.memory_space<vmem>>, vector<6x160xf32>,
    return
  }
}

</mosaic_0001>

<bundles_post_ra>
// kernel: tpu_custom_call.1
= control target key start
LH: loop header
LB: loop body
LE: loop exit
PB: predicated region body
PF: predicated region fallthrough
CT: control target
= control target key end

     0   :  { %7 = vsyncpa [#allocation3], 0  ;;  %s281_s0 = inlined_call_operand.hbm [shape: bf16[6,32], index: 0, kind: input, shape index: {}]   ;;  %s282_s1 = inlined_call_operand.hbm [shape: bf16[32,160], index: 1, kind: input, shape index: {}]   ;;  %s283_s2 = inlined_call_operand.hbm [shape: f32[6,160], index: 2, kind: output, shape index: {}]  }
   0x1   :  { %8 = vsyncpa [#allocation6], 0 }
   0x2   :  { %9 = vsyncpa [#allocation4], 0  ;;  %s217_s9 = smov [#allocation2]   ;;  %s218_s11 = smov [#allocation5]  }
   0x3   :  { %s16_s10 = sshll.u32 %s217_s9, 4  ;;  %s25_s12 = sshll.u32 %s218_s11, 4  ;;  %s17_s10 = int_to_ptr.vmem [resolvable:$true] %s16_s10  ;;  %s238_s12 = int_to_ptr.vmem [resolvable:$true] %s25_s12 }
   0x4   :  { %s145_s15 = scalar_lea.hbm %s281_s0, 64 }
   0x5   :  { %p146_p0 = scmp.ne.s32.totalorder %s281_s0, %s145_s15  ;;  %p149_p1 = scmp.lt.u32.totalorder %s145_s15, %s281_s0 }
   0x7   :  { %p151_p2 = pnand %p149_p1, %p146_p0 }
   0x9   :  { %154 = shalt.err (!%p151_p2)
}
   0xa   :  { %s155_s20 = scalar_lea.vmem %s17_s10, 64  ;;  %p160_p4 = scmp.lt.s32.totalorder %s17_s10, %s17_s10 }
   0xb   :  { %p156_p3 = scmp.ne.s32.totalorder %s17_s10, %s155_s20  ;;  %p161_p5 = scmp.lt.s32.totalorder %s155_s20, %s155_s20 }
   0xd   :  { %p162_p6 = por %p161_p5, %p160_p4 }
   0xf   :  { %p163_p7 = pnand %p162_p6, %p156_p3 }
  0x11   :  { %166 = shalt.err (!%p163_p7)
}
  0x12   :  { %19 = dma.hbm_to_vmem [thread:$0]  %s281_s0, 64, %s17_s10, [#allocation3]  }
  0x13   :  { %s167_s25 = scalar_lea.hbm %s282_s1, 512 }
  0x14   :  { %p168_p8 = scmp.ne.s32.totalorder %s282_s1, %s167_s25  ;;  %p171_p9 = scmp.lt.u32.totalorder %s167_s25, %s282_s1 }
  0x16   :  { %p173_p10 = pnand %p171_p9, %p168_p8 }
  0x18   :  { %176 = shalt.err (!%p173_p10)
}
  0x19   :  { %s177_s30 = scalar_lea.vmem %s238_s12, 512  ;;  %p182_p12 = scmp.lt.s32.totalorder %s238_s12, %s238_s12 }
  0x1a   :  { %p178_p11 = scmp.ne.s32.totalorder %s238_s12, %s177_s30  ;;  %p183_p13 = scmp.lt.s32.totalorder %s177_s30, %s177_s30 }
  0x1c   :  { %p184_p0 = por %p183_p13, %p182_p12 }
  0x1e   :  { %p185_p1 = pnand %p184_p0, %p178_p11 }
  0x20   :  { %188 = shalt.err (!%p185_p1)
}
  0x21   :  { %s219_s0 = smov 128   ;;  %s220_s3 = smov 8  }
  0x22   :  { %31 = dma.hbm_to_vmem [thread:$0]  %s282_s1, 512, %s238_s12, [#allocation6], %s219_s0, %s219_s0, %s220_s3  }
  0x23   :  { %211 = dma.done.wait [#allocation3], 64  }
  0x24   :  { %212 = vsyncadd [#allocation3], 4294967232 }
  0x25   :  { %213 = dma.done.wait [#allocation6], 512  }
  0x26   :  { %214 = vsyncadd [#allocation6], 4294966784  ;;  %v221_v0 = vmov 0   ;;  %v139_v1 = vld [vmem:[#allocation5 + $0x4] ss:$8 sps:$4 sm:$0xff]   ;;  %vm64_vm0 = vcmask 261120  }
  0x27   :  { %100 = vmatprep.mubr.bf16.mxu0 %v221_v0  ;;  %v141_v2 = vld [vmem:[#allocation5] ss:$8 sps:$4 sm:$0xff]   ;;  %68 = vmatprep.subr.bf16.mxu0 %v139_v1  ;;  %v142_v3 = vld [vmem:[#allocation5 + $0x14] ss:$8 sps:$4 sm:$0xff]   ;;  %v144_v4 = vld [vmem:[#allocation5 + $0x10] ss:$8 sps:$4 sm:$0xff]  }
  0x28   :  { %69 = vmatpush1.bf16.msra.mxu0 %v141_v2  ;;  %v39_v5 = vld [vmem:[#allocation2] sm:$0x7]  ;;  %s222_s6 = smov [#allocation7]   ;;  %vm110_vm1 = vcmask 259072  }
  0x29   :  { %70 = vmatprep.subr.bf16.mxu0 %v142_v3  ;;  %s118_s7 = sshll.u32 %s222_s6, 4  ;;  %s119_s7 = int_to_ptr.vmem [resolvable:$true] %s118_s7 }
  0x2a   :  { %s189_s1 = scalar_lea.vmem %s119_s7, 256  ;;  %p194_p3 = scmp.lt.s32.totalorder %s119_s7, %s119_s7 }
  0x2b   :  { %p190_p2 = scmp.ne.s32.totalorder %s119_s7, %s189_s1  ;;  %p195_p4 = scmp.lt.s32.totalorder %s189_s1, %s189_s1 }
  0x2c   :  { %71 = vmatpush1.bf16.msra.mxu0 %v144_v4 }
  0x2d   :  { %p196_p5 = por %p195_p4, %p194_p3 }
  0x2f   :  { %132 = vmatmul.mubr.msk.bf16.vlgmr.msra.gmra.mrb[0].mxu0 %vm64_vm0, %v39_v5  ;;  %p197_p6 = pnand %p196_p5, %p190_p2 }
 0x102   :  { %v102_v6 = vpop.f32.mrb[0].mxu0 }
 0x103   :  { %109 = vst [vmem:[#allocation7] sm:$0x3f] %v102_v6  ;;  %v104_v7 = vpop.f32.mrb[1].mxu0 }
 0x104   :  { %111 = vst.msk [vmem:[#allocation7 + $0x8] sm:$0x3f] %vm110_vm1, %v104_v7  ;;  %v106_v8 = vpop.f32.mrb[2].mxu0 }
 0x105   :  { %v107_v9 = vpop.f32.mrb[3].mxu0 }
 0x106   :  { %200 = shalt.err (!%p197_p6)
}
 0x107   :  { %s201_s10 = scalar_lea.hbm %s283_s2, 256 }
 0x108   :  { %p202_p7 = scmp.ne.s32.totalorder %s283_s2, %s201_s10  ;;  %p205_p8 = scmp.lt.u32.totalorder %s201_s10, %s283_s2 }
 0x10a   :  { %p207_p9 = pnand %p205_p8, %p202_p7 }
 0x10c   :  { %210 = shalt.err (!%p207_p9)
}
 0x10d   :  { %121 = dma.vmem_to_hbm [thread:$0]  %s119_s7, 256, %s283_s2, [#allocation4]  }
 0x10e   :  { %215 = dma.done.wait [#allocation4], 256  }
 0x10f   :  { %216 = vsyncadd [#allocation4], 4294967040 }
 0x110   :  { %125 = vsyncpa [#allocation3], 1 }
 0x111   :  { %126 = vsyncpa [#allocation6], 1 }
 0x112   :  { %127 = vsyncpa [#allocation4], 1 }

</bundles_post_ra>
